<compile_context>
chip_gen: v5e
topology: v5e:2x2
jax: 0.10.0
libtpu: 0.0.40
codegen_flags: <defaults>
</compile_context>

<pallas_src>
import math
import jax
import jax.numpy as jnp
from jax.experimental import pallas as pl
from jax.experimental.pallas import tpu as pltpu


def _sdpa_kernel(temperature):
    inv_temp = 1.0 / float(temperature)

    def kernel(q_ref, k_ref, v_ref, mask_ref, out_ref, attn_ref):
        # Blocks: q (BT, TQ, D), k (BT, Lk, D), v (BT, Lk, Dv), mask (BT, TQ, Lk) int8.
        # Fold the temperature into q (multiply, on the small Lq*D side).
        q = q_ref[...] * jnp.float32(inv_temp)
        k = k_ref[...]
        v = v_ref[...]
        m = mask_ref[...]

        # scores = q @ k^T : contract the last dims directly (no materialized transpose).
        s = jnp.einsum("bqd,bkd->bqk", q, k, preferred_element_type=jnp.float32)

        # masked_fill(mask, -1e10). Applying it unconditionally is identical to the
        # torch `if sum(mask) != 0` gate (all-zero mask => no-op).
        s = jnp.where(m != 0, jnp.float32(-10000000000.0), s)

        # softmax over dim=2 (last dim)
        s_max = jnp.max(s, axis=-1, keepdims=True)
        e = jnp.exp(s - s_max)
        denom = jnp.sum(e, axis=-1, keepdims=True)
        p = e * pl.reciprocal(denom, approx=False)   # exact: attn is checked at 1e-5

        attn_ref[...] = p.astype(attn_ref.dtype)
        # output = attn @ v   (MXU)
        out_ref[...] = jnp.einsum(
            "bqk,bkv->bqv", p, v, preferred_element_type=jnp.float32
        ).astype(out_ref.dtype)

    return kernel


def _pick_tq(lq, cap=256):
    """q-tile rows: full Lq if small, else the largest multiple-of-8 divisor <= cap."""
    if lq <= cap:
        return lq
    t = cap - (cap % 8)
    while t >= 8:
        if lq % t == 0:
            return t
        t -= 8
    return lq  # fallback: untiled (block == full dim is always legal)


def _pick_bt(b, tq, lk):
    """Fuse batch elements per grid step when the per-step (tq, lk) tile is tiny."""
    if tq * lk > 128 * 128:
        return 1
    for cand in (8, 4, 2):
        if cand <= b and b % cand == 0:
            return cand
    return 1


def scaled_dot_product_attention(q, k, v, mask, temperature):
    """q: (B,Lq,D), k: (B,Lk,D), v: (B,Lk,Dv), mask: (B,Lq,Lk) 0/1. Returns (output, attn)."""
    B, Lq, D = q.shape
    _, Lk, _ = k.shape
    Dv = v.shape[-1]

    # Shrink mask traffic: int8 is enough for a 0/1 mask.
    mask8 = mask.astype(jnp.int8)

    tq = _pick_tq(Lq)
    bt = _pick_bt(B, tq, Lk)

    grid = (B // bt, Lq // tq)

    grid_spec = pl.GridSpec(
        grid=grid,
        in_specs=[
            pl.BlockSpec((bt, tq, D), lambda b, qi: (b, qi, 0)),
            pl.BlockSpec((bt, Lk, D), lambda b, qi: (b, 0, 0)),   # K resident across q-tiles
            pl.BlockSpec((bt, Lk, Dv), lambda b, qi: (b, 0, 0)),  # V resident across q-tiles
            pl.BlockSpec((bt, tq, Lk), lambda b, qi: (b, qi, 0)),
        ],
        out_specs=[
            pl.BlockSpec((bt, tq, Dv), lambda b, qi: (b, qi, 0)),
            pl.BlockSpec((bt, tq, Lk), lambda b, qi: (b, qi, 0)),
        ],
    )

    out, attn = pl.pallas_call(
        _sdpa_kernel(temperature),
        out_shape=(
            jax.ShapeDtypeStruct((B, Lq, Dv), jnp.float32),
            jax.ShapeDtypeStruct((B, Lq, Lk), jnp.float32),
        ),
        grid_spec=grid_spec,
        compiler_params=pltpu.CompilerParams(
            dimension_semantics=("parallel", "parallel"),
            vmem_limit_bytes=48 * 1024 * 1024,  # safe on v5e/v6e (128 MiB) and v7x (64 MiB)
        ),
    )(q, k, v, mask8)
    return out, attn


def reference_sdpa(q, k, v, mask, temperature):
    """Pure-JAX reference mirroring the PyTorch forward (including the sum(mask) gate)."""
    attn = jnp.einsum("bqd,bkd->bqk", q, k) / temperature
    attn = jnp.where(jnp.logical_and(jnp.sum(mask) != 0, mask != 0),
                     -10000000000.0, attn)
    attn = jax.nn.softmax(attn, axis=2)
    out = jnp.einsum("bqk,bkv->bqv", attn, v)
    return out, attn


if __name__ == "__main__":
    key = jax.random.PRNGKey(0)
    kq, kk, kv, km = jax.random.split(key, 4)

    B, Lq, Lk, D, Dv = 2, 8, 8, 32, 32
    temperature = math.sqrt(D)

    # Deterministic "parameters" from __init__ (unused in the active forward path).
    time_plus_weight = jnp.zeros((1,), jnp.float32)
    time_mul_weight = jnp.ones((1,), jnp.float32)

    q = jax.random.normal(kq, (B, Lq, D), jnp.float32)
    k = jax.random.normal(kk, (B, Lk, D), jnp.float32)
    v = jax.random.normal(kv, (B, Lk, Dv), jnp.float32)
    # Boolean mask with some True entries, passed as int (0/1).
    mask = (jax.random.uniform(km, (B, Lq, Lk)) < 0.2).astype(jnp.int32)

    out, attn = scaled_dot_product_attention(q, k, v, mask, temperature)
    jax.block_until_ready((out, attn))

    out_ref, attn_ref = reference_sdpa(q, k, v, mask, temperature)
    assert jnp.allclose(out, out_ref, atol=1e-5, rtol=1e-5), "output mismatch"
    assert jnp.allclose(attn, attn_ref, atol=1e-5, rtol=1e-5), "attn mismatch"

    # Also exercise the all-zero-mask path (gate removal must stay a no-op).
    zmask = jnp.zeros((B, Lq, Lk), jnp.int32)
    out0, attn0 = scaled_dot_product_attention(q, k, v, zmask, temperature)
    out0_ref, attn0_ref = reference_sdpa(q, k, v, zmask, temperature)
    jax.block_until_ready((out0, attn0))
    assert jnp.allclose(out0, out0_ref, atol=1e-5, rtol=1e-5), "output mismatch (zero mask)"
    assert jnp.allclose(attn0, attn0_ref, atol=1e-5, rtol=1e-5), "attn mismatch (zero mask)"

    print("KERNEL_OK")
</pallas_src>

<mosaic_0001>
module attributes {stable_mosaic.version = 11 : i64} {
  func.func @kernel(%arg0: i32, %arg1: i32, %arg2: memref<2x8x32xf32, #tpu.memory_space<vmem>>, %arg3: memref<2x8x32xf32, #tpu.memory_space<vmem>>, %arg4: memref<2x8x32xf32, #tpu.memory_space<vmem>>, %arg5: memref<2x8x8xi8, #tpu.memory_space<vmem>>, %arg6: memref<2x8x32xf32, #tpu.memory_space<vmem>>, %arg7: memref<2x8x8xf32, #tpu.memory_space<vmem>>) attributes {dimension_semantics = [#tpu.dimension_semantics<parallel>, #tpu.dimension_semantics<parallel>], iteration_bounds = array<i64: 1, 1>, scalar_prefetch = 0 : i64, scratch_operands = 0 : i64, tpu.core_type = #tpu.core_type<tc>, window_params = [{transform_indices = @transform_0, window_bounds = array<i64: 2, 8, 32>}, {transform_indices = @transform_1, window_bounds = array<i64: 2, 8, 32>}, {transform_indices = @transform_2, window_bounds = array<i64: 2, 8, 32>}, {transform_indices = @transform_3, window_bounds = array<i64: 2, 8, 8>}, {transform_indices = @transform_4, window_bounds = array<i64: 2, 8, 32>}, {transform_indices = @transform_5, window_bounds = array<i64: 2, 8, 8>}]} {
    %c0 = arith.constant 0 : index
    %c0_0 = arith.constant 0 : index
    %c0_1 = arith.constant 0 : index
    %0 = vector.load %arg2[%c0, %c0_0, %c0_1] : memref<2x8x32xf32, #tpu.memory_space<vmem>>, vector<2x8x32xf32>
    %cst = arith.constant 0.176776692 : f32
    %1 = vector.broadcast %cst : f32 to vector<2x8x32xf32>
    %2 = arith.mulf %0, %1 : vector<2x8x32xf32>
    %c0_2 = arith.constant 0 : index
    %c0_3 = arith.constant 0 : index
    %c0_4 = arith.constant 0 : index
    %3 = vector.load %arg3[%c0_2, %c0_3, %c0_4] : memref<2x8x32xf32, #tpu.memory_space<vmem>>, vector<2x8x32xf32>
    %c0_5 = arith.constant 0 : index
    %c0_6 = arith.constant 0 : index
    %c0_7 = arith.constant 0 : index
    %4 = vector.load %arg4[%c0_5, %c0_6, %c0_7] : memref<2x8x32xf32, #tpu.memory_space<vmem>>, vector<2x8x32xf32>
    %c0_8 = arith.constant 0 : index
    %c0_9 = arith.constant 0 : index
    %c0_10 = arith.constant 0 : index
    %5 = vector.load %arg5[%c0_8, %c0_9, %c0_10] : memref<2x8x8xi8, #tpu.memory_space<vmem>>, vector<2x8x8xi8>
    "tpu.trace_start"() <{level = 10 : i32, message = "bqd,bkd->bqk"}> : () -> ()
    %cst_11 = arith.constant dense<0.000000e+00> : vector<2x8x8xf32>
    %6 = tpu.matmul %2, %3, %cst_11 {dimension_numbers = #tpu.dot_dimension_numbers<[2], [2], [1], [1], [0, 0, 0, 1, 1, 1], [0], [0]>} : vector<2x8x32xf32>, vector<2x8x32xf32>, vector<2x8x8xf32> -> vector<2x8x8xf32>
    %c0_i8 = arith.constant 0 : i8
    "tpu.trace_stop"() : () -> ()
    %7 = vector.broadcast %c0_i8 : i8 to vector<2x8x8xi8>
    %8 = arith.cmpi ne, %5, %7 : vector<2x8x8xi8>
    %cst_12 = arith.constant -1.000000e+10 : f32
    %9 = vector.broadcast %cst_12 : f32 to vector<2x8x8xf32>
    %10 = arith.select %8, %9, %6 : vector<2x8x8xi1>, vector<2x8x8xf32>
    %cst_13 = arith.constant dense<0xFF800000> : vector<2x8xf32>
    %11 = vector.multi_reduction <maximumf>, %10, %cst_13 [2] : vector<2x8x8xf32> to vector<2x8xf32>
    %12 = vector.shape_cast %11 : vector<2x8xf32> to vector<2x8x1xf32>
    %13 = vector.broadcast %12 : vector<2x8x1xf32> to vector<2x8x8xf32>
    %14 = arith.subf %10, %13 : vector<2x8x8xf32>
    %15 = math.exp %14 : vector<2x8x8xf32>
    %cst_14 = arith.constant dense<0.000000e+00> : vector<2x8xf32>
    %16 = vector.multi_reduction <add>, %15, %cst_14 [2] : vector<2x8x8xf32> to vector<2x8xf32>
    %17 = vector.shape_cast %16 : vector<2x8xf32> to vector<2x8x1xf32>
    %18 = tpu.reciprocal %17 : vector<2x8x1xf32> -> vector<2x8x1xf32>
    %19 = vector.broadcast %18 : vector<2x8x1xf32> to vector<2x8x8xf32>
    %20 = arith.mulf %15, %19 : vector<2x8x8xf32>
    %c0_15 = arith.constant 0 : index
    %c0_16 = arith.constant 0 : index
    %c0_17 = arith.constant 0 : index
    %21 = vector.load %arg7[%c0_15, %c0_16, %c0_17] : memref<2x8x8xf32, #tpu.memory_space<vmem>>, vector<2x8x8xf32>
    tpu.vector_store %arg7[%c0_15, %c0_16, %c0_17], %20 {strides = array<i32>} : memref<2x8x8xf32, #tpu.memory_space<vmem>>, vector<2x8x8xf32>,
    "tpu.trace_start"() <{level = 10 : i32, message = "bqk,bkv->bqv"}> : () -> ()
    %cst_18 = arith.constant dense<0.000000e+00> : vector<2x8x32xf32>
    %22 = tpu.matmul %20, %4, %cst_18 {dimension_numbers = #tpu.dot_dimension_numbers<[2], [1], [1], [2], [0, 0, 0, 1, 1, 2], [0], [0]>} : vector<2x8x8xf32>, vector<2x8x32xf32>, vector<2x8x32xf32> -> vector<2x8x32xf32>
    "tpu.trace_stop"() : () -> ()
    %c0_19 = arith.constant 0 : index
    %c0_20 = arith.constant 0 : index
    %c0_21 = arith.constant 0 : index
    %23 = vector.load %arg6[%c0_19, %c0_20, %c0_21] : memref<2x8x32xf32, #tpu.memory_space<vmem>>, vector<2x8x32xf32>
    tpu.vector_store %arg6[%c0_19, %c0_20, %c0_21], %22 {strides = array<i32>} : memref<2x8x32xf32, #tpu.memory_space<vmem>>, vector<2x8x32xf32>,
    return
  }
  func.func @transform_0(%arg0: i32, %arg1: i32) -> (i32, i32, i32) {
    %c0_i32 = arith.constant 0 : i32
    %c0_i32_0 = arith.constant 0 : i32
    return %arg0, %arg1, %c0_i32 : i32, i32, i32
  }
  func.func @transform_1(%arg0: i32, %arg1: i32) -> (i32, i32, i32) {
    %c0_i32 = arith.constant 0 : i32
    %c0_i32_0 = arith.constant 0 : i32
    %c0_i32_1 = arith.constant 0 : i32
    return %arg0, %c0_i32, %c0_i32_0 : i32, i32, i32
  }
  func.func @transform_2(%arg0: i32, %arg1: i32) -> (i32, i32, i32) {
    %c0_i32 = arith.constant 0 : i32
    %c0_i32_0 = arith.constant 0 : i32
    %c0_i32_1 = arith.constant 0 : i32
    return %arg0, %c0_i32, %c0_i32_0 : i32, i32, i32
  }
  func.func @transform_3(%arg0: i32, %arg1: i32) -> (i32, i32, i32) {
    %c0_i32 = arith.constant 0 : i32
    %c0_i32_0 = arith.constant 0 : i32
    return %arg0, %arg1, %c0_i32 : i32, i32, i32
  }
  func.func @transform_4(%arg0: i32, %arg1: i32) -> (i32, i32, i32) {
    %c0_i32 = arith.constant 0 : i32
    %c0_i32_0 = arith.constant 0 : i32
    return %arg0, %arg1, %c0_i32 : i32, i32, i32
  }
  func.func @transform_5(%arg0: i32, %arg1: i32) -> (i32, i32, i32) {
    %c0_i32 = arith.constant 0 : i32
    %c0_i32_0 = arith.constant 0 : i32
    return %arg0, %arg1, %c0_i32 : i32, i32, i32
  }
}

</mosaic_0001>

<bundles_post_ra>
// kernel: tpu_custom_call.1
= control target key start
LH: loop header
LB: loop body
LE: loop exit
PB: predicated region body
PF: predicated region fallthrough
CT: control target
= control target key end

     0   :  { %11 = vsyncpa [#allocation3], 0  ;;  %s564_s0 = inlined_call_operand.hbm [shape: f32[2,8,32], index: 0, kind: input, shape index: {}]   ;;  %s565_s1 = inlined_call_operand.hbm [shape: f32[2,8,32], index: 1, kind: input, shape index: {}]   ;;  %s566_s2 = inlined_call_operand.hbm [shape: f32[2,8,32], index: 2, kind: input, shape index: {}]   ;;  %s567_s3 = inlined_call_operand.hbm [shape: s8[2,8,8], index: 3, kind: input, shape index: {}]   ;;  %s568_s4 = inlined_call_operand.hbm [shape: f32[2,8,32], index: 4, kind: output, shape index: {0}]   ;;  %s569_s5 = inlined_call_operand.hbm [shape: f32[2,8,8], index: 5, kind: output, shape index: {1}]  }
   0x1   :  { %12 = vsyncpa [#allocation6], 0 }
   0x2   :  { %13 = vsyncpa [#allocation9], 0 }
   0x3   :  { %14 = vsyncpa [#allocation4], 0 }
   0x4   :  { %15 = vsyncpa [#allocation12], 0  ;;  %s33_s20 = sshll.u32 %s565_s1, 4  ;;  %s476_s21 = smov [#allocation5]   ;;  %s34_s20 = int_to_ptr.hbm [resolvable:$true] %s33_s20 }
   0x5   :  { %s35_s22 = sshll.u32 %s476_s21, 4  ;;  %s20_s25 = sshll.u32 %s564_s0, 4  ;;  %s36_s22 = int_to_ptr.vmem [resolvable:$true] %s35_s22  ;;  %s21_s25 = int_to_ptr.hbm [resolvable:$true] %s20_s25 }
   0x6   :  { %s477_s26 = smov 128   ;;  %s478_s27 = smov 8  }
   0x7   :  { %41 = dma.hbm_to_vmem [thread:$0]  %s34_s20, 256, %s36_s22, [#allocation6], %s477_s26, %s477_s26, %s478_s27  }
   0x8   :  { %s479_s28 = smov [#allocation2]   ;;  %s46_s1 = sshll.u32 %s566_s2, 4  ;;  %s47_s1 = int_to_ptr.hbm [resolvable:$true] %s46_s1 }
   0x9   :  { %s22_s29 = sshll.u32 %s479_s28, 4  ;;  %s59_s8 = sshll.u32 %s567_s3, 4  ;;  %s23_s29 = int_to_ptr.vmem [resolvable:$true] %s22_s29  ;;  %s60_s8 = int_to_ptr.hbm [resolvable:$true] %s59_s8 }
   0xa   :  { %28 = dma.hbm_to_vmem [thread:$0]  %s21_s25, 256, %s23_s29, [#allocation3], %s477_s26, %s477_s26, %s478_s27  }
   0xb   :  { %s480_s9 = smov [#allocation7]   ;;  %s481_s11 = smov [#allocation8]  }
   0xc   :  { %s48_s10 = sshll.u32 %s480_s9, 4  ;;  %s61_s2 = sshll.u32 %s481_s11, 4  ;;  %s49_s10 = int_to_ptr.vmem [resolvable:$true] %s48_s10  ;;  %s62_s2 = int_to_ptr.vmem [resolvable:$true] %s61_s2 }
   0xd   :  { %54 = dma.hbm_to_vmem [thread:$0]  %s47_s1, 256, %s49_s10, [#allocation6], %s477_s26, %s477_s26, %s478_s27  }
   0xe   :  { %s482_s12 = smov 32   ;;  %s483_s13 = smov 2  }
   0xf   :  { %67 = dma.hbm_to_vmem [thread:$0]  %s60_s8, 64, %s62_s2, [#allocation9], %s482_s12, %s482_s12, %s483_s13  }
  0x10   :  { %466 = dma.done.wait [#allocation3], 256  }
  0x11   :  { %467 = vsyncadd [#allocation3], 4294967040 }
  0x12   :  { %468 = dma.done.wait [#allocation6], 512  }
  0x13   :  { %469 = vsyncadd [#allocation6], 4294966784 }
  0x14   :  { %470 = dma.done.wait [#allocation9], 64  }
  0x15   :  { %471 = vsyncadd [#allocation9], 4294967232  ;;  %vm96_vm0 = vcmask 261120   ;;  %v90_v0 = vld [vmem:[#allocation5] sm:$0xff]  ;;  %v86_v1 = vld [vmem:[#allocation2] sm:$0xff]  ;;  %v484_v8 = vmov 0  }
  0x16   :  { %v91_v2 = vld [vmem:[#allocation5 + $0x8] sm:$0xff]  ;;  %297 = vmatpush.xpose.msk.msra.mxu0 %vm96_vm0, %v90_v0  ;;  %v88_v3 = vmul.f32 0.17677669, %v86_v1  ;;  %v87_v4 = vld [vmem:[#allocation2 + $0x8] sm:$0xff]  ;;  %v94_v6 = vld [vmem:[#allocation8] sm:$0x3] }
  0x17   :  { %299 = vmatpush.xpose.msk.msra.mxu1 %vm96_vm0, %v91_v2  ;;  %v89_v5 = vmul.f32 0.17677669, %v87_v4  ;;  %vm149_vm1 = vnez %v94_v6  ;;  %v95_v7 = vld [vmem:[#allocation8 + $0x2] sm:$0x3]  ;;  %vm159_vm4 = vcmask 64512   ;;  %v92_v29 = vld [vmem:[#allocation7] sm:$0xff] }
  0x18   :  { %v151_v9 = vsel %vm149_vm1, 16843009, %v484_v8  ;;  %vm150_vm2 = vnez %v95_v7  ;;  %228 = vmatpush.msra.mxu2 %v92_v29  ;;  %v93_v30 = vld [vmem:[#allocation7 + $0x8] sm:$0xff]  ;;  %s485_s3 = smov [#allocation11]   ;;  %s277_s17 = sshll.u32 %s569_s5, 4  ;;  %s278_s17 = int_to_ptr.hbm [resolvable:$true] %s277_s17 }
  0x19   :  { %298 = vmatmul.msk.f32.vlgmr.msra.gmra.mxu0 %vm96_vm0, %v88_v3  ;;  %v153_v10 = vunpack.c.0.s8 %v151_v9  ;;  %v152_v11 = vsel %vm150_vm2, 16843009, %v484_v8  ;;  %251 = vmatpush.msra.mxu3 %v93_v30  ;;  %s275_s14 = sshll.u32 %s485_s3, 4  ;;  %s486_s18 = smov [#allocation10]   ;;  %s276_s14 = int_to_ptr.vmem [resolvable:$true] %s275_s14 }
  0x1a   :  { %300 = vmatmul.msk.f32.vlgmr.msra.gmra.mxu1 %vm96_vm0, %v89_v5  ;;  %v154_v12 = vunpack.c.0.s8 %v152_v11  ;;  %s262_s19 = sshll.u32 %s486_s18, 4  ;;  %s264_s22 = sshll.u32 %s568_s4, 4  ;;  %s263_s19 = int_to_ptr.vmem [resolvable:$true] %s262_s19  ;;  %s265_s22 = int_to_ptr.hbm [resolvable:$true] %s264_s22 }
  0x1b   :  { %vm155_vm3 = vcmp.ne.s32.totalorder %v153_v10, 0 }
  0x1c   :  { %vm156_vm5 = vcmp.ne.s32.totalorder %v154_v12, 0 }
  0x96   :  { %v120_v13 = vpop.f32.mrf.mxu0 }
  0x97   :  { %v157_v14 = vsel %vm155_vm3, -1e+10, %v120_v13  ;;  %v146_v16 = vpop.f32.mrf.mxu1 }
  0x98   :  { %v160_v15 = vsel %vm159_vm4, %v157_v14, -inf  ;;  %v158_v17 = vsel %vm156_vm5, -1e+10, %v146_v16 }
  0x99   :  { %161 = vmax.xlane.f32.xlu0 %v160_v15  ;;  %v163_v18 = vsel %vm159_vm4, %v158_v17, -inf }
  0xa1   :  { %164 = vmax.xlane.f32.xlu0 %v163_v18 }
 0x10c   :  { %v162_v19 = vpop.xlane.xlu0 %161 }
 0x10d   :  { %v166_v20 = vsub.f32 %v157_v14, %v162_v19 }
 0x10f   :  { %v168_v21 = vmul.f32 1.442695, %v166_v20 }
 0x111   :  { %314 = vpow2.f32 %v168_v21 }
 0x114   :  { %v165_v22 = vpop.xlane.xlu0 %164 }
 0x115   :  { %v167_v23 = vsub.f32 %v158_v17, %v165_v22 }
 0x117   :  { %v315_v24 = vpop.eup %314  ;;  %v170_v25 = vmul.f32 1.442695, %v167_v23 }
 0x118   :  { %v172_v26 = vsel %vm159_vm4, %v315_v24, 0.0 }
 0x119   :  { %316 = vpow2.f32 %v170_v25  ;;  %173 = vadd.xlane.f32.xlu1 %v172_v26 }
 0x11f   :  { %v317_v27 = vpop.eup %316 }
 0x120   :  { %v175_v28 = vsel %vm159_vm4, %v317_v27, 0.0 }
 0x121   :  { %176 = vadd.xlane.f32.xlu1 %v175_v28 }
 0x18c   :  { %v174_v31 = vpop.xlane.xlu1 %173 }
 0x18d   :  { %318 = vrcp.f32 %v174_v31  ;;  %v189_v36 = vand.u32 2147483648, %v174_v31  ;;  %v187_v38 = vand.u32 2147483647, %v174_v31  ;;  %vm183_vm7 = vweird.f32 %v174_v31 }
 0x18f   :  { %v190_v41 = vor.u32 1.1754944e-38, %v189_v36  ;;  %vm188_vm9 = vcmp.eq.f32.partialorder %v187_v38, 8.507059e+37 }
 0x193   :  { %v319_v32 = vpop.eup %318 }
 0x194   :  { %v179_v33 = vmul.f32 %v319_v32, %v174_v31  ;;  %v177_v34 = vpop.xlane.xlu1 %176  ;;  %vm184_vm6 = vweird.f32 %v319_v32 }
 0x195   :  { %320 = vrcp.f32 %v177_v34  ;;  %vm185_vm8 = vmor %vm183_vm7, %vm184_vm6  ;;  %v203_v47 = vand.u32 2147483648, %v177_v34  ;;  %v201_v49 = vand.u32 2147483647, %v177_v34  ;;  %vm197_vm11 = vweird.f32 %v177_v34 }
 0x196   :  { %v180_v35 = vsub.f32 1.0, %v179_v33 }
 0x197   :  { %v204_v51 = vor.u32 1.1754944e-38, %v203_v47  ;;  %vm202_vm13 = vcmp.eq.f32.partialorder %v201_v49, 8.507059e+37 }
 0x198   :  { %v181_v37 = vmul.f32 %v319_v32, %v180_v35 }
 0x19a   :  { %v182_v39 = vadd.f32 %v319_v32, %v181_v37 }
 0x19b   :  { %v321_v40 = vpop.eup %320 }
 0x19c   :  { %v193_v42 = vmul.f32 %v321_v40, %v177_v34  ;;  %v186_v43 = vsel %vm185_vm8, %v319_v32, %v182_v39  ;;  %vm198_vm10 = vweird.f32 %v321_v40 }
 0x19d   :  { %v191_v44 = vsel %vm188_vm9, %v190_v41, %v186_v43  ;;  %vm199_vm12 = vmor %vm197_vm11, %vm198_vm10 }
 0x19e   :  { %v194_v45 = vsub.f32 1.0, %v193_v42  ;;  %v206_v46 = vmul.f32 %v315_v24, %v191_v44 }
 0x1a0   :  { %v195_v48 = vmul.f32 %v321_v40, %v194_v45  ;;  %301 = vmatmul.msk.f32.vlgmr.msra.gmra.mxu2 %vm159_vm4, %v206_v46  ;;  %208 = vst.msk [vmem:[#allocation11] sm:$0xff] %vm159_vm4, %v206_v46 }
 0x1a2   :  { %v196_v50 = vadd.f32 %v321_v40, %v195_v48 }
 0x1a4   :  { %v200_v52 = vsel %vm199_vm12, %v321_v40, %v196_v50 }
 0x1a5   :  { %v205_v53 = vsel %vm202_vm13, %v204_v51, %v200_v52 }
 0x1a6   :  { %v207_v54 = vmul.f32 %v317_v27, %v205_v53 }
 0x1a8   :  { %302 = vmatmul.msk.f32.vlgmr.msra.gmra.mxu3 %vm159_vm4, %v207_v54  ;;  %209 = vst.msk [vmem:[#allocation11 + $0x8] sm:$0xff] %vm159_vm4, %v207_v54 }
 0x1a9   :  { %283 = dma.vmem_to_hbm [thread:$0]  %s276_s14, 256, %s278_s17, [#allocation12], %s477_s26, %s477_s26, %s478_s27  }
 0x223   :  { %v230_v55 = vpop.f32.mrf.mxu2 }
 0x224   :  { %256 = vst.msk [vmem:[#allocation10] sm:$0xff] %vm96_vm0, %v230_v55 }
 0x22b   :  { %v253_v56 = vpop.f32.mrf.mxu3 }
 0x22c   :  { %257 = vst.msk [vmem:[#allocation10 + $0x8] sm:$0xff] %vm96_vm0, %v253_v56 }
 0x22d   :  { %270 = dma.vmem_to_hbm [thread:$0]  %s263_s19, 256, %s265_s22, [#allocation4], %s477_s26, %s477_s26, %s478_s27  }
 0x22e   :  { %472 = dma.done.wait [#allocation4], 256  }
 0x22f   :  { %473 = vsyncadd [#allocation4], 4294967040 }
 0x230   :  { %474 = dma.done.wait [#allocation12], 256  }
 0x231   :  { %475 = vsyncadd [#allocation12], 4294967040 }
 0x232   :  { %292 = vsyncpa [#allocation3], 1 }
 0x233   :  { %293 = vsyncpa [#allocation6], 1 }
 0x234   :  { %294 = vsyncpa [#allocation9], 1 }
 0x235   :  { %295 = vsyncpa [#allocation4], 1 }
 0x236   :  { %296 = vsyncpa [#allocation12], 1 }

</bundles_post_ra>
